<compile_context>
chip_gen: v7x
topology: tpu7x:2x2x1
jax: 0.10.0
libtpu: 0.0.40
codegen_flags: <defaults>
</compile_context>

<pallas_src>
import jax
import jax.numpy as jnp
from jax.experimental import pallas as pl
from jax.experimental.pallas import tpu as pltpu


def _identity_dma_kernel(x_hbm_ref, o_hbm_ref, sem):
    # Whole forward pass of the module: one full-array HBM->HBM DMA copy.
    cp = pltpu.make_async_copy(x_hbm_ref, o_hbm_ref, sem)
    cp.start()
    cp.wait()


def _lane_dense_2d(shape):
    """Pick a (rows, cols) factorization with cols a large multiple of 128."""
    total = 1
    for d in shape:
        total *= int(d)
    for cols in (32768, 16384, 8192, 4096, 2048, 1024, 512, 256, 128):
        if total % cols == 0:
            return total // cols, cols
    return 1, total  # fallback: single contiguous row (DMA doesn't care)


@jax.jit
def identity_pallas(x: jax.Array) -> jax.Array:
    """Identity forward pass done on-device with a Pallas kernel."""
    orig_shape = x.shape
    rows, cols = _lane_dense_2d(orig_shape)
    x2 = x.reshape(rows, cols)  # free layout glue; preserves element order

    out2 = pl.pallas_call(
        _identity_dma_kernel,
        out_shape=jax.ShapeDtypeStruct((rows, cols), x.dtype),
        # Raw HBM refs: no automatic HBM<->VMEM pipelining, no tiling.
        in_specs=[pl.BlockSpec(memory_space=pl.ANY)],
        out_specs=pl.BlockSpec(memory_space=pl.ANY),
        scratch_shapes=[pltpu.SemaphoreType.DMA(())],
    )(x2)

    return out2.reshape(orig_shape)


if __name__ == "__main__":
    key = jax.random.PRNGKey(0)
    # Small NCHW-shaped input consistent with a generic model forward.
    x = jax.random.normal(key, (2, 4, 16, 16), dtype=jnp.float32)

    y = identity_pallas(x)
    jax.block_until_ready(y)

    assert y.shape == x.shape and y.dtype == x.dtype
    assert bool(jnp.array_equal(y, x))
    print("KERNEL_OK")
</pallas_src>

<mosaic_0001>
module attributes {stable_mosaic.version = 11 : i64} {
  func.func @_identity_dma_kernel(%arg0: memref<1x2048xf32, #tpu.memory_space<any>>, %arg1: memref<1x2048xf32, #tpu.memory_space<any>>, %arg2: memref<!tpu.dma_semaphore, #tpu.memory_space<semaphore_mem>>) attributes {dimension_semantics = [], scalar_prefetch = 0 : i64, scratch_operands = 1 : i64, tpu.core_type = #tpu.core_type<tc>} {
    tpu.enqueue_dma source(%arg0 : memref<1x2048xf32, #tpu.memory_space<any>>) target(%arg1 : memref<1x2048xf32, #tpu.memory_space<any>>) target_semaphore(%arg2 : memref<!tpu.dma_semaphore, #tpu.memory_space<semaphore_mem>>)
    tpu.wait_dma2 semaphore(%arg2 : memref<!tpu.dma_semaphore, #tpu.memory_space<semaphore_mem>>) src(%arg0 : memref<1x2048xf32, #tpu.memory_space<any>>) dst(%arg1 : memref<1x2048xf32, #tpu.memory_space<any>>)
    return
  }
}

</mosaic_0001>

<bundles_post_ra>
// kernel: identity_pallas.1
= control target key start
LH: loop header
LB: loop body
LE: loop exit
PB: predicated region body
PF: predicated region fallthrough
CT: control target
= control target key end

     0   :  { %s92_s0 = inlined_call_operand.vmem [shape: f32[1,2048], index: 0, kind: input, shape index: {}]   ;;  %s93_s1 = inlined_call_operand.vmem [shape: f32[1,2048], index: 1, kind: output, shape index: {}]  }
   0x1   :  { %v38_v0 = vld [vmem:[%s92_s0] sm:$0xff]  ;;  %v40_v1 = vld [vmem:[%s92_s0 + $0x8] sm:$0xff] }
   0x2   :  { %39 = vst [vmem:[%s93_s1] sm:$0xff] %v38_v0  ;;  %41 = vst [vmem:[%s93_s1 + $0x8] sm:$0xff] %v40_v1 }
   0x3   :  { %49 = vsyncadd [#allocation2], 256 }
   0x4   :  { %68 = dma.done.wait [#allocation2], 256 }
   0x5   :  { %69 = vsyncadd [#allocation2], 4294967040 }
   0x6   :  { %53 = vsyncmov [#allocation2] }
   0x9   :  { %s54_s14 = vpop.sfrf %53 }
   0xa   :  { %p67_p0 = scmp.ne.s32.totalorder %s54_s14, 0 }
   0xc   :  { %58 = shalt.err (%p67_p0)  }

</bundles_post_ra>
